<compile_context>
chip_gen: v7x
topology: tpu7x:2x2x1
jax: 0.10.0
libtpu: 0.0.40
codegen_flags: <defaults>
</compile_context>

<pallas_src>
import jax
import jax.numpy as jnp
from jax.experimental import pallas as pl
from jax.experimental.pallas import tpu as pltpu


def _convlstm_cell_kernel(p_ref, w_ref, b_ref, c_ref, h_out_ref, c_out_ref):
    """Fused i2h-conv-as-matmul + LSTMFused pointwise for one M (lane) tile.

    Transposed lane-dense layout (lanes = flattened batch*spatial):
      p_ref : (K, TM)    bf16 im2col patches     (K = Cin*ksz*ksz)
      w_ref : (4C, K)    bf16 flattened i2h weight, pre-multiplied by 2
      b_ref : (4C, 1)    f32  i2h bias,            pre-multiplied by 2
      c_ref : (C, TM)    f32  previous cell state
    """
    C = c_ref.shape[0]
    # i2h conv == (2*W) @ patches + (2*b); the 2x from LSTMFused(iGates, iGates)
    # is folded into the parameters, so no per-element doubling here.
    gates = jnp.dot(w_ref[...], p_ref[...], preferred_element_type=jnp.float32)
    gates = gates + b_ref[...]                      # (4C, TM) + (4C, 1) bcast
    i_g = jax.nn.sigmoid(gates[0 * C:1 * C, :])     # in
    f_g = jax.nn.sigmoid(gates[1 * C:2 * C, :])     # forget
    g_g = jnp.tanh(gates[2 * C:3 * C, :])           # cell
    o_g = jax.nn.sigmoid(gates[3 * C:4 * C, :])     # out
    c_new = f_g * c_ref[...] + i_g * g_g            # f32 cell update
    h_out_ref[...] = o_g * jnp.tanh(c_new)
    c_out_ref[...] = c_new


def _pick_m_tile(M):
    # Prefer >=2 lane-dense tiles (multiples of 128): the "parallel" grid axis
    # then feeds both v7x TensorCores; otherwise run one full-size tile.
    for t in (2048, 1024, 512, 256, 128):
        if M % t == 0 and M // t >= 2:
            return t
    return M


def convlstm_cell_pallas(patches_t, w2, b2, c):
    """patches_t: (K, M) bf16, w2: (4C, K) bf16, b2: (4C, 1) f32, c: (C, M) f32."""
    K, M = patches_t.shape
    C4 = w2.shape[0]
    C = C4 // 4
    tm = _pick_m_tile(M)
    out_shape = (jax.ShapeDtypeStruct((C, M), jnp.float32),
                 jax.ShapeDtypeStruct((C, M), jnp.float32))
    return pl.pallas_call(
        _convlstm_cell_kernel,
        out_shape=out_shape,
        grid=(M // tm,),
        in_specs=[
            pl.BlockSpec((K, tm), lambda m: (0, m)),
            pl.BlockSpec((C4, K), lambda m: (0, 0)),
            pl.BlockSpec((C4, 1), lambda m: (0, 0)),
            pl.BlockSpec((C, tm), lambda m: (0, m)),
        ],
        out_specs=[
            pl.BlockSpec((C, tm), lambda m: (0, m)),
            pl.BlockSpec((C, tm), lambda m: (0, m)),
        ],
        input_output_aliases={3: 1},   # cell state updated in place
        compiler_params=pltpu.CompilerParams(
            dimension_semantics=("parallel",)),
    )(patches_t, w2, b2, c)


# ----------------------------- plain-JAX glue ------------------------------

def im2col_t(x_nchw, ksz):
    """(B, Cin, H, W) -> (Cin*ksz*ksz, B*H*W) bf16.  K ordered (cin, ky, kx) to
    match torch Conv2d weight (Cout, Cin, KH, KW) flattened to (Cout, Cin*KH*KW);
    M ordered (b, h, w)."""
    B, Cin, H, W = x_nchw.shape
    pad = (ksz - 1) // 2
    xp = jnp.pad(x_nchw, ((0, 0), (0, 0), (pad, pad), (pad, pad)))
    cols = [xp[:, :, ky:ky + H, kx:kx + W]
            for ky in range(ksz) for kx in range(ksz)]
    p = jnp.stack(cols, axis=2)                 # (B, Cin, ksz*ksz, H, W)
    p = jnp.transpose(p, (1, 2, 0, 3, 4))       # (Cin, ksz*ksz, B, H, W)
    return p.reshape(Cin * ksz * ksz, B * H * W).astype(jnp.bfloat16)


def init_params(key, cinp, chid, ksz):
    """Deterministic torch-style i2h parameters (h2h exists in __init__ but is
    never used in forward, so it is not materialized)."""
    fan_in = cinp * ksz * ksz
    bound = fan_in ** -0.5
    kw, kb = jax.random.split(key)
    w = jax.random.uniform(kw, (4 * chid, cinp, ksz, ksz), jnp.float32, -bound, bound)
    b = jax.random.uniform(kb, (4 * chid,), jnp.float32, -bound, bound)
    b = b.at[3 * chid:].set(1.0)                # i2h.bias[3*chid:].fill_(1)
    return w, b


def prepare_params(w, b):
    """Fold the LSTMFused 2x (iGates + iGates) into the parameters once; weight
    bf16 for the MXU, bias f32 (added after f32 accumulation)."""
    c4 = w.shape[0]
    k = w.shape[1] * w.shape[2] * w.shape[3]
    w2 = (2.0 * w).reshape(c4, k).astype(jnp.bfloat16)
    b2 = (2.0 * b).reshape(c4, 1).astype(jnp.float32)
    return w2, b2


def conv_lstm_cell_forward(x, hidden, w, b, ksz):
    """ConvLSTMCell.forward.  x: (B, Cin, H, W) NCHW; hidden: None or (hx, cx)
    each (B, Chid, H, W).  Returns (hy, cy) in NCHW."""
    B, _, H, W = x.shape
    chid = w.shape[0] // 4
    if hidden is None:                          # init_hidden -> zeros
        hidden = (jnp.zeros((B, chid, H, W), jnp.float32),
                  jnp.zeros((B, chid, H, W), jnp.float32))
    _hx, cx = hidden   # hx is unused: LSTMFused receives iGates twice (as in torch)
    w2, b2 = prepare_params(w, b)
    patches_t = im2col_t(x, ksz)
    c_t = jnp.transpose(cx, (1, 0, 2, 3)).reshape(chid, B * H * W).astype(jnp.float32)
    h_new, c_new = convlstm_cell_pallas(patches_t, w2, b2, c_t)
    hy = jnp.transpose(h_new.reshape(chid, B, H, W), (1, 0, 2, 3))
    cy = jnp.transpose(c_new.reshape(chid, B, H, W), (1, 0, 2, 3))
    return hy, cy


def reference_forward(x, hidden, w, b):
    """Pure-JAX f32 reference of ConvLSTMCell.forward (sanity check only)."""
    B, _, H, W = x.shape
    chid = w.shape[0] // 4
    cx = (jnp.zeros((B, chid, H, W), jnp.float32) if hidden is None else hidden[1])
    gates = jax.lax.conv_general_dilated(
        x, w, window_strides=(1, 1), padding="SAME",
        dimension_numbers=("NCHW", "OIHW", "NCHW"))
    gates = 2.0 * (gates + b[None, :, None, None])
    i_g = jax.nn.sigmoid(gates[:, 0 * chid:1 * chid])
    f_g = jax.nn.sigmoid(gates[:, 1 * chid:2 * chid])
    g_g = jnp.tanh(gates[:, 2 * chid:3 * chid])
    o_g = jax.nn.sigmoid(gates[:, 3 * chid:4 * chid])
    cy = f_g * cx + i_g * g_g
    hy = o_g * jnp.tanh(cy)
    return hy, cy


if __name__ == "__main__":
    key = jax.random.PRNGKey(0)
    B, Cin, Chid, H, W, ksz = 2, 4, 8, 16, 16, 3

    k_x, k_h, k_c, k_p = jax.random.split(key, 4)
    x = jax.random.normal(k_x, (B, Cin, H, W), jnp.float32)
    hx = jax.random.normal(k_h, (B, Chid, H, W), jnp.float32)  # unused by forward
    cx = jax.random.normal(k_c, (B, Chid, H, W), jnp.float32)
    w, b = init_params(k_p, Cin, Chid, ksz)

    hy, cy = conv_lstm_cell_forward(x, (hx, cx), w, b, ksz)
    jax.block_until_ready(hy)
    jax.block_until_ready(cy)
    assert hy.shape == (B, Chid, H, W) and cy.shape == (B, Chid, H, W)

    # Sanity check vs an f32 reference (loose tolerance: bf16 matmul operands).
    hy_ref, cy_ref = reference_forward(x, (hx, cx), w, b)
    assert float(jnp.max(jnp.abs(hy - hy_ref))) < 5e-2
    assert float(jnp.max(jnp.abs(cy - cy_ref))) < 5e-2

    print("KERNEL_OK")
</pallas_src>

<mosaic_0001>
module attributes {stable_mosaic.version = 11 : i64} {
  func.func @_convlstm_cell_kernel(%arg0: i32, %arg1: memref<36x256xbf16, #tpu.memory_space<vmem>>, %arg2: memref<32x36xbf16, #tpu.memory_space<vmem>>, %arg3: memref<32x1xf32, #tpu.memory_space<vmem>>, %arg4: memref<8x256xf32, #tpu.memory_space<vmem>>, %arg5: memref<8x256xf32, #tpu.memory_space<vmem>>, %arg6: memref<8x256xf32, #tpu.memory_space<vmem>>) attributes {dimension_semantics = [#tpu.dimension_semantics<parallel>], iteration_bounds = array<i64: 2>, scalar_prefetch = 0 : i64, scratch_operands = 0 : i64, tpu.core_type = #tpu.core_type<tc>, window_params = [{transform_indices = @transform_0, window_bounds = array<i64: 36, 256>}, {pipeline_mode = #tpu.pipeline_mode<synchronous>, transform_indices = @transform_1, window_bounds = array<i64: 32, 36>}, {pipeline_mode = #tpu.pipeline_mode<synchronous>, transform_indices = @transform_2, window_bounds = array<i64: 32, 1>}, {transform_indices = @transform_3, window_bounds = array<i64: 8, 256>}, {transform_indices = @transform_4, window_bounds = array<i64: 8, 256>}, {transform_indices = @transform_5, window_bounds = array<i64: 8, 256>}]} {
    %c0 = arith.constant 0 : index
    %c0_0 = arith.constant 0 : index
    %0 = vector.load %arg2[%c0, %c0_0] : memref<32x36xbf16, #tpu.memory_space<vmem>>, vector<32x36xbf16>
    %c0_1 = arith.constant 0 : index
    %c0_2 = arith.constant 0 : index
    %1 = vector.load %arg1[%c0_1, %c0_2] : memref<36x256xbf16, #tpu.memory_space<vmem>>, vector<36x256xbf16>
    %cst = arith.constant dense<0.000000e+00> : vector<32x256xf32>
    %2 = tpu.matmul %0, %1, %cst {dimension_numbers = #tpu.dot_dimension_numbers<[1], [0], [0], [1], [0, 0, 1, 1], [], []>} : vector<32x36xbf16>, vector<36x256xbf16>, vector<32x256xf32> -> vector<32x256xf32>
    %c0_3 = arith.constant 0 : index
    %c0_4 = arith.constant 0 : index
    %3 = vector.load %arg3[%c0_3, %c0_4] : memref<32x1xf32, #tpu.memory_space<vmem>>, vector<32x1xf32>
    %4 = vector.broadcast %3 : vector<32x1xf32> to vector<32x256xf32>
    %5 = arith.addf %2, %4 : vector<32x256xf32>
    %6 = vector.extract_strided_slice %5 {offsets = [0, 0], sizes = [8, 256], strides = [1, 1]} : vector<32x256xf32> to vector<8x256xf32>
    %7 = arith.negf %6 : vector<8x256xf32>
    %8 = math.exp %7 : vector<8x256xf32>
    %cst_5 = arith.constant 1.000000e+00 : f32
    %9 = vector.broadcast %cst_5 : f32 to vector<8x256xf32>
    %10 = arith.addf %9, %8 : vector<8x256xf32>
    %11 = arith.divf %9, %10 : vector<8x256xf32>
    %12 = vector.extract_strided_slice %5 {offsets = [8, 0], sizes = [8, 256], strides = [1, 1]} : vector<32x256xf32> to vector<8x256xf32>
    %13 = arith.negf %12 : vector<8x256xf32>
    %14 = math.exp %13 : vector<8x256xf32>
    %cst_6 = arith.constant 1.000000e+00 : f32
    %15 = vector.broadcast %cst_6 : f32 to vector<8x256xf32>
    %16 = arith.addf %15, %14 : vector<8x256xf32>
    %17 = arith.divf %15, %16 : vector<8x256xf32>
    %18 = vector.extract_strided_slice %5 {offsets = [16, 0], sizes = [8, 256], strides = [1, 1]} : vector<32x256xf32> to vector<8x256xf32>
    %19 = math.tanh %18 : vector<8x256xf32>
    %20 = vector.extract_strided_slice %5 {offsets = [24, 0], sizes = [8, 256], strides = [1, 1]} : vector<32x256xf32> to vector<8x256xf32>
    %21 = arith.negf %20 : vector<8x256xf32>
    %22 = math.exp %21 : vector<8x256xf32>
    %cst_7 = arith.constant 1.000000e+00 : f32
    %23 = vector.broadcast %cst_7 : f32 to vector<8x256xf32>
    %24 = arith.addf %23, %22 : vector<8x256xf32>
    %25 = arith.divf %23, %24 : vector<8x256xf32>
    %c0_8 = arith.constant 0 : index
    %c0_9 = arith.constant 0 : index
    %26 = vector.load %arg4[%c0_8, %c0_9] : memref<8x256xf32, #tpu.memory_space<vmem>>, vector<8x256xf32>
    %27 = arith.mulf %17, %26 : vector<8x256xf32>
    %28 = arith.mulf %11, %19 : vector<8x256xf32>
    %29 = arith.addf %27, %28 : vector<8x256xf32>
    %30 = math.tanh %29 : vector<8x256xf32>
    %31 = arith.mulf %25, %30 : vector<8x256xf32>
    %c0_10 = arith.constant 0 : index
    %c0_11 = arith.constant 0 : index
    %32 = vector.load %arg5[%c0_10, %c0_11] : memref<8x256xf32, #tpu.memory_space<vmem>>, vector<8x256xf32>
    tpu.vector_store %arg5[%c0_10, %c0_11], %31 {strides = array<i32>} : memref<8x256xf32, #tpu.memory_space<vmem>>, vector<8x256xf32>,
    %c0_12 = arith.constant 0 : index
    %c0_13 = arith.constant 0 : index
    %33 = vector.load %arg6[%c0_12, %c0_13] : memref<8x256xf32, #tpu.memory_space<vmem>>, vector<8x256xf32>
    tpu.vector_store %arg6[%c0_12, %c0_13], %29 {strides = array<i32>} : memref<8x256xf32, #tpu.memory_space<vmem>>, vector<8x256xf32>,
    return
  }
  func.func @transform_0(%arg0: i32) -> (i32, i32) {
    %c0_i32 = arith.constant 0 : i32
    %c0_i32_0 = arith.constant 0 : i32
    return %c0_i32, %arg0 : i32, i32
  }
  func.func @transform_1(%arg0: i32) -> (i32, i32) {
    %c0_i32 = arith.constant 0 : i32
    %c0_i32_0 = arith.constant 0 : i32
    %c0_i32_1 = arith.constant 0 : i32
    return %c0_i32, %c0_i32_0 : i32, i32
  }
  func.func @transform_2(%arg0: i32) -> (i32, i32) {
    %c0_i32 = arith.constant 0 : i32
    %c0_i32_0 = arith.constant 0 : i32
    %c0_i32_1 = arith.constant 0 : i32
    return %c0_i32, %c0_i32_0 : i32, i32
  }
  func.func @transform_3(%arg0: i32) -> (i32, i32) {
    %c0_i32 = arith.constant 0 : i32
    %c0_i32_0 = arith.constant 0 : i32
    return %c0_i32, %arg0 : i32, i32
  }
  func.func @transform_4(%arg0: i32) -> (i32, i32) {
    %c0_i32 = arith.constant 0 : i32
    %c0_i32_0 = arith.constant 0 : i32
    return %c0_i32, %arg0 : i32, i32
  }
  func.func @transform_5(%arg0: i32) -> (i32, i32) {
    %c0_i32 = arith.constant 0 : i32
    %c0_i32_0 = arith.constant 0 : i32
    return %c0_i32, %arg0 : i32, i32
  }
}

</mosaic_0001>

<bundles_post_ra>
// kernel: tpu_custom_call.1
= control target key start
LH: loop header
LB: loop body
LE: loop exit
PB: predicated region body
PF: predicated region fallthrough
CT: control target
= control target key end

     0   :  { %11 = vsyncpa [#allocation4], 0  ;;  %s1183_s0 = inlined_call_operand.vmem [shape: bf16[36,512], index: 0, kind: input, shape index: {}]   ;;  %s1184_s1 = inlined_call_operand.vmem [shape: bf16[32,36], index: 1, kind: input, shape index: {}]   ;;  %s1185_s2 = inlined_call_operand.vmem [shape: f32[32,1], index: 2, kind: input, shape index: {}]   ;;  %s1186_s3 = inlined_call_operand.hbm [shape: f32[8,512], index: 3, kind: input, shape index: {}, may-alias: {3,5}]   ;;  %s1187_s4 = inlined_call_operand.hbm [shape: f32[8,512], index: 4, kind: output, shape index: {0}]   ;;  %s1188_s5 = inlined_call_operand.hbm [shape: f32[8,512], index: 5, kind: output, shape index: {1}, may-alias: {3,5}]  }
   0x1   :  { %13 = vsyncpa [#allocation4 + $0x1], 0 }
   0x2   :  { %14 = vsyncpa [#allocation5], 0 }
   0x3   :  { %16 = vsyncpa [#allocation5 + $0x1], 0 }
   0x4   :  { %17 = vsyncpa [#allocation8], 0 }
   0x5   :  { %19 = vsyncpa [#allocation8 + $0x1], 0  ;;  %s973_s18 = smov 0   ;;  %s975_s19 = smov 0  }
   0x6   :  { %s977_s20 = smov 0   ;;  %s979_s21 = smov 0  }
   0x7 LB: > { %s994_s22 = sadd.s32 4294967295, %s937_s21   ;;  %s671_s23 = sadd.s32 4294967294, %s937_s21   ;;  %s937_s21 = sphi %s979_s21, %s1203_s21   ;;  %s933_s20 = sphi %s977_s20, %s1202_s20   ;;  %s929_s19 = sphi %s975_s19, %s1201_s19   ;;  %s925_s18 = sphi %s973_s18, %s1200_s18  }
   0x8   : > { %s998_s24 = sadd.s32 1, %s937_s21   ;;  %s32_s25 = sadd.s32 1, %s933_s20 }
   0x9   : > { %s29_s26 = ssub.s32 %s937_s21, %s998_s24  ;;  %p39_p0 = scmp.ne.s32.totalorder %s933_s20, %s929_s19 }
   0xa   : > { %p30_p1 = scmp.eq.s32.totalorder %s29_s26, 0  ;;  %p40_p2 = scmp.eq.s32.totalorder %s937_s21, 0 }
   0xb   : > { %p113_p3 = scmp.ne.s32.totalorder %s929_s19, %s925_s18  ;;  %p114_p4 = scmp.eq.s32.totalorder %s994_s22, 0 }
   0xc   : > { %s1010_s27 = scalar_select %p30_p1, %s933_s20, %s32_s25  }
   0xd   : > { %p1012_p5 = por %p40_p2, %p39_p0  ;;  %p1016_p6 = por %p114_p4, %p113_p3 }
   0xe   : > { %p137_p7 = scmp.eq.s32.totalorder %s994_s22, 1  ;;  %p143_p8 = scmp.eq.s32.totalorder %s671_s23, 1 }
   0xf   : > { %s1193_s29 = scalar_select %p1016_p6, 1, 0 }
  0x10   : > { %p1021_p9 = por %p137_p7, %p39_p0  ;;  %p1025_p10 = por %p143_p8, %p113_p3 }
  0x11   : > { %p1189_p11 = scmp.ge.s32.totalorder %s937_s21, 2 }
  0x12   : > { %s1194_s30 = scalar_select %p1021_p9, 1, 0 }
  0x13   : > { %s1195_s6 = scalar_select %p1025_p10, 1, 0 }
  0x14   : > { %191 = sbr.rel (%p1189_p11) target bundleno = 59 (0x3b), region = 24 }
  0x1b   : > { %194 = sbr.rel (!%p1012_p5) target bundleno = 34 (0x22), region = 28  ;;  %s196_s7 = sand.u32 (%p1012_p5), 1, %s933_s20  }
  0x1c   : > { %s708_s8 = sshll.u32 (%p1012_p5), %s937_s21, 3  ;;  %s718_s9 = smul.u32 (%p1012_p5), 40, %s196_s7 }
  0x1d   : > { %s201_s12 = scalar_lea.vmem (%p1012_p5), %s1183_s0, %s708_s8 }
  0x1e   : > { %v237_v0 = vld [vmem:[%s201_s12] sm:$0xff] (%p1012_p5)  ;;  %v239_v1 = vld [vmem:[%s201_s12 + $0x10] sm:$0xff] (%p1012_p5)  ;;  %s198_s13 = scalar_lea.vmem (%p1012_p5), [#allocation2], %s718_s9 }
  0x1f   : > { %v241_v2 = vld [vmem:[%s201_s12 + $0x20] sm:$0xff] (%p1012_p5)  ;;  %v243_v3 = vld [vmem:[%s201_s12 + $0x30] sm:$0xff] (%p1012_p5)  ;;  %238 = vst [vmem:[%s198_s13] sm:$0xff] (%p1012_p5), %v237_v0  ;;  %240 = vst [vmem:[%s198_s13 + $0x8] sm:$0xff] (%p1012_p5), %v239_v1 }
  0x20   : > { %v245_v4 = vld [vmem:[%s201_s12 + $0x40] sm:$0xff] (%p1012_p5)  ;;  %242 = vst [vmem:[%s198_s13 + $0x10] sm:$0xff] (%p1012_p5), %v241_v2  ;;  %244 = vst [vmem:[%s198_s13 + $0x18] sm:$0xff] (%p1012_p5), %v243_v3 }
  0x21   : > { %246 = vst [vmem:[%s198_s13 + $0x20] sm:$0xff] (%p1012_p5), %v245_v4 }
  0x22 PF: > { %s253_s14 = sand.u32 1, %s933_s20   ;;  %s709_s15 = sshll.u32 %s937_s21, 8 }
  0x23   : > { %s676_s16 = sshll.u32 %s253_s14, 4  ;;  %s1044_s25 = scalar_lea.hbm %s1186_s3, %s709_s15 }
  0x24   : > { %s257_s26 = scalar_lea.vmem [#allocation3], %s676_s16  ;;  %s254_s8 = scalar_lea.sflag [#allocation4], %s253_s14 }
  0x25   : > { %s265_s7 = sshll.u32 %s257_s26, 4  ;;  %s811_s9 = scalar_lea.hbm %s1044_s25, 256  ;;  %s266_s7 = int_to_ptr.vmem [resolvable:$true] %s265_s7 }
  0x26   : > { %p812_p12 = scmp.ne.s32.totalorder %s1044_s25, %s811_s9  ;;  %s815_s12 = scalar_lea.hbm %s1186_s3, 512 }
  0x27   : > { %p816_p1 = scmp.lt.u32.totalorder %s1044_s25, %s1186_s3  ;;  %p817_p2 = scmp.lt.u32.totalorder %s815_s12, %s811_s9 }
  0x28   : > { %p813_p13 = pnand %p812_p12, %p1012_p5  ;;  %p819_p4 = scmp.lt.u32.totalorder %s811_s9, %s1044_s25 }
  0x29   : > { %p818_p3 = por %p817_p2, %p816_p1 }
  0x2a   : > { %p814_p0 = pneg %p813_p13 }
  0x2b   : > { %p820_p7 = por %p819_p4, %p818_p3 }
  0x2d   : > { %p821_p8 = pnand %p820_p7, %p814_p0 }
  0x2f   : > { %824 = shalt.err (!%p821_p8)
}
  0x30   : > { %s825_s14 = scalar_lea.vmem %s266_s7, 256  ;;  %s939_s16 = smov [#allocation3]  }
  0x31   : > { %p826_p11 = scmp.ne.s32.totalorder %s266_s7, %s825_s14  ;;  %s829_s17 = sshll.u32 %s939_s16, 4  ;;  %s830_s17 = int_to_ptr.vmem [resolvable:$false] %s829_s17 }
  0x32   : > { %s831_s23 = scalar_lea.vmem %s830_s17, 512  ;;  %p832_p10 = scmp.lt.s32.totalorder %s266_s7, %s830_s17 }
  0x33   : > { %p827_p12 = pnand %p826_p11, %p1012_p5  ;;  %p833_p9 = scmp.lt.s32.totalorder %s831_s23, %s825_s14 }
  0x35   : > { %p828_p13 = pneg %p827_p12  ;;  %p834_p6 = por %p833_p9, %p832_p10 }
  0x37   : > { %p835_p1 = pnand %p834_p6, %p828_p13 }
  0x39   : > { %838 = shalt.err (!%p835_p1)
}
  0x3a   : > { %720 = dma.hbm_to_vmem [thread:$0]  (%p1012_p5), %s1044_s25, 256, %s266_s7, %s254_s8  }
  0x3b PF: > { %p679_p0 = scmp.ge.s32.totalorder %s937_s21, 1  ;;  %p270_p2 = scmp.lt.s32.totalorder %s937_s21, 3 }
  0x3d   : > { %p271_p11 = pnand %p679_p0, %p270_p2 }
  0x3e   : > { %s1066_s26 = sand.u32 (!%p271_p11), 1, %s929_s19   ;;  %p1196_p5 = scmp.ne.s32.totalorder (!%p271_p11), %s1193_s29, 0 }
  0x3f   : > { %274 = sbr.rel (%p271_p11) target bundleno = 371 (0x173), region = 70  ;;  %s1070_s10 = sshll.u32 (!%p271_p11), %s1066_s26, 4 }
  0x40   : > { %s719_s9 = smul.u32 (!%p271_p11), 40, %s1066_s26  ;;  %s284_s25 = scalar_lea.sflag (!%p271_p11), [#allocation4], %s1066_s26 }
  0x41   : > { %s287_s7 = scalar_lea.vmem (!%p271_p11), [#allocation3], %s1070_s10 }
  0x42   : > { %s279_s28 = scalar_lea.vmem (!%p271_p11), [#allocation2], %s719_s9 }
  0x46   : > { %912 = dma.done.wait (%p1196_p5), %s284_s25, 256  }
  0x47   : > { %914 = vsyncadd (%p1196_p5), %s284_s25, 4294967040  ;;  %v940_v5 = vmov 0   ;;  %v769_v6 = vld [vmem:[%s279_s28 + $0x4] ss:$8 sps:$4 sm:$0xff]   ;;  %v771_v7 = vld [vmem:[%s279_s28] ss:$8 sps:$4 sm:$0xff]  }
  0x48   : > { %442 = vmatprep.mubr.bf16.mxu0 %v940_v5  ;;  %452 = vmatprep.mubr.bf16.mxu1 %v940_v5  ;;  %v772_v8 = vld [vmem:[%s279_s28 + $0x14] ss:$8 sps:$4 sm:$0xff]   ;;  %v336_v9 = vld [vmem:[%s279_s28 + $0x20] sm:$0x33]  ;;  %v774_v10 = vld [vmem:[%s279_s28 + $0x10] ss:$8 sps:$4 sm:$0xff]  }
  0x49   : > { %767 = vset.pattern.permute.xlu0 %v940_v5  ;;  %768 = vset.pattern.permute.xlu1 %v940_v5  ;;  %v690_v11 = vcombine.high %v336_v9, %v336_v9  ;;  %v689_v12 = vcombine.low %v336_v9, %v336_v9  ;;  %vm403_vm0 = vcmask 1041408   ;;  %v337_v13 = vld [vmem:[%s1185_s2] sm:$0xff]  ;;  %v339_v14 = vld [vmem:[%s1185_s2 + $0x10] sm:$0xff]  ;;  %v338_v15 = vld [vmem:[%s1185_s2 + $0x8] sm:$0xff]  ;;  %vm396_vm1 = vcmask 293888   ;;  %s710_s25 = sshll.u32 %s994_s22, 8 }
  0x4a   : > { %410 = vmatprep.subr.bf16.mxu0 %v769_v6  ;;  %712 = vmatprep.subr.bf16.mxu1 %v769_v6  ;;  %v340_v16 = vld [vmem:[%s1185_s2 + $0x18] sm:$0xff]  ;;  %v777_v18 = vld [vmem:[%s1184_s1] sm:$0xff]   ;;  %v778_v19 = vld [vmem:[%s1184_s1 + $0x8] sm:$0xff]   ;;  %s322_s29 = scalar_lea.vmem [#allocation7], %s1070_s10  ;;  %s1107_s12 = scalar_lea.hbm %s1188_s5, %s710_s25 }
  0x4b   : > { %411 = vmatpush1.bf16.msra.mxu0 %v771_v7  ;;  %715 = vmatpush1.bf16.msra.mxu1 %v771_v7  ;;  %v405_v17 = vsel %vm403_vm0, %v689_v12, 0  ;;  %v501_v59 = vld [vmem:[%s287_s7] sm:$0xff]  ;;  %v502_v61 = vld [vmem:[%s287_s7 + $0x8] sm:$0xff]  ;;  %s551_s8 = sshll.u32 %s322_s29, 4  ;;  %s523_s13 = scalar_lea.sflag [#allocation8], %s1066_s26  ;;  %s1109_s8 = int_to_ptr.vmem [resolvable:$true] %s551_s8 }
  0x4c   : > { %412 = vmatprep.subr.bf16.mxu0 %v772_v8  ;;  %713 = vmatprep.subr.bf16.mxu1 %v772_v8  ;;  %s839_s15 = scalar_lea.vmem %s1109_s8, 256  ;;  %p1197_p9 = scmp.ne.s32.totalorder %s1194_s30, 0 }
  0x4d   : > { %343 = vperm.xlu0 %767, %v337_v13   ;;  %353 = vperm.xlu1 %768, %v339_v14   ;;  %p840_p6 = scmp.ne.s32.totalorder %s1109_s8, %s839_s15  ;;  %s941_s14 = smov [#allocation7]  }
  0x4e   : > { %s843_s16 = sshll.u32 %s941_s14, 4  ;;  %s844_s16 = int_to_ptr.vmem [resolvable:$false] %s843_s16 }
  0x4f   : > { %413 = vmatpush1.bf16.msra.mxu0 %v774_v10  ;;  %716 = vmatpush1.bf16.msra.mxu1 %v774_v10  ;;  %p841_p10 = pnand %p840_p6, %p1197_p9  ;;  %s845_s17 = scalar_lea.vmem %s844_s16, 512 }
  0x50   : > { %691 = vmatprep.subr.msk.bf16.mxu0 %vm403_vm0, %v690_v11  ;;  %714 = vmatprep.subr.msk.bf16.mxu1 %vm403_vm0, %v690_v11  ;;  %p846_p4 = scmp.lt.s32.totalorder %s1109_s8, %s844_s16  ;;  %p847_p7 = scmp.lt.s32.totalorder %s845_s17, %s839_s15 }
  0x51   : > { %348 = vperm.xlu0 %767, %v338_v15   ;;  %358 = vperm.xlu1 %768, %v340_v16   ;;  %p842_p3 = pneg %p841_p10 }
  0x52   : > { %p848_p8 = por %p847_p7, %p846_p4 }
  0x53   : > { %415 = vmatpush1.bf16.msra.mxu0 %v405_v17  ;;  %717 = vmatpush1.bf16.msra.mxu1 %v405_v17 }
  0x54   : > { %p849_p12 = pnand %p848_p8, %p842_p3 }
  0x56   : > { %692 = vmatmul.mubr.msk.bf16.vlgmr.msra.gmra.mrb[0].mxu0 %vm396_vm1, %v777_v18  ;;  %693 = vmatmul.mubr.msk.bf16.vlgmr.msra.gmra.mrb[0].mxu1 %vm396_vm1, %v778_v19 }
  0xcc   : > { %v344_v20 = vpop.permute.xlu0 %343  ;;  %v354_v22 = vpop.permute.xlu1 %353 }
  0xd0   : > { %v349_v21 = vpop.permute.xlu0 %348  ;;  %v359_v38 = vpop.permute.xlu1 %358 }
 0x129   : > { %v444_v23 = vpop.f32.mrb[0].mxu0  ;;  %v454_v24 = vpop.f32.mrb[0].mxu1 }
 0x12a   : > { %v445_v25 = vadd.f32 %v444_v23, %v344_v20  ;;  %v446_v26 = vpop.f32.mrb[1].mxu0  ;;  %v456_v27 = vpop.f32.mrb[1].mxu1  ;;  %v455_v42 = vadd.f32 %v454_v24, %v354_v22 }
 0x12b   : > { %v447_v28 = vadd.f32 %v446_v26, %v344_v20  ;;  %v448_v29 = vpop.f32.mrb[2].mxu0  ;;  %v458_v30 = vpop.f32.mrb[2].mxu1  ;;  %v457_v43 = vadd.f32 %v456_v27, %v354_v22 }
 0x12c   : > { %v694_v31 = vmul.f32 -1.442695, %v445_v25  ;;  %v449_v32 = vadd.f32 %v448_v29, %v349_v21  ;;  %v450_v33 = vpop.f32.mrb[3].mxu0  ;;  %v460_v34 = vpop.f32.mrb[3].mxu1  ;;  %v459_v40 = vadd.f32 %v458_v30, %v359_v38 }
 0x12d   : > { %v695_v35 = vmul.f32 -1.442695, %v447_v28  ;;  %v451_v36 = vadd.f32 %v450_v33, %v349_v21  ;;  %v461_v41 = vadd.f32 %v460_v34, %v359_v38 }
 0x12e   : > { %779 = vpow2.f32 %v694_v31  ;;  %v696_v37 = vmul.f32 -1.442695, %v449_v32  ;;  %v698_v44 = vmul.f32 -1.442695, %v459_v40 }
 0x12f   : > { %781 = vpow2.f32 %v695_v35  ;;  %v697_v39 = vmul.f32 -1.442695, %v451_v36  ;;  %v699_v45 = vmul.f32 -1.442695, %v461_v41 }
 0x130   : > { %783 = vpow2.f32 %v696_v37 }
 0x131   : > { %785 = vpow2.f32 %v697_v39 }
 0x132   : > { %787 = vtanh.f32 %v455_v42 }
 0x133   : > { %789 = vtanh.f32 %v457_v43 }
 0x134   : > { %791 = vpow2.f32 %v698_v44 }
 0x135   : > { %793 = vpow2.f32 %v699_v45 }
 0x138   : > { %v780_v46 = vpop.eup %779 }
 0x139   : > { %v782_v47 = vpop.eup %781  ;;  %v469_v48 = vadd.f32 1.0, %v780_v46 }
 0x13a   : > { %v784_v49 = vpop.eup %783  ;;  %v470_v50 = vadd.f32 1.0, %v782_v47 }
 0x13b   : > { %v786_v51 = vpop.eup %785  ;;  %795 = vrcp.f32 %v469_v48  ;;  %v481_v52 = vadd.f32 1.0, %v784_v49 }
 0x13c   : > { %797 = vrcp.f32 %v470_v50  ;;  %v482_v53 = vadd.f32 1.0, %v786_v51  ;;  %v788_v54 = vpop.eup %787 }
 0x13d   : > { %799 = vrcp.f32 %v481_v52  ;;  %v790_v55 = vpop.eup %789 }
 0x13e   : > { %801 = vrcp.f32 %v482_v53  ;;  %v792_v56 = vpop.eup %791 }
 0x13f   : > { %v794_v57 = vpop.eup %793  ;;  %v495_v63 = vadd.f32 1.0, %v792_v56 }
 0x140   : > { %v496_v2 = vadd.f32 1.0, %v794_v57 }
 0x141   : > { %803 = vrcp.f32 %v495_v63 }
 0x142   : > { %805 = vrcp.f32 %v496_v2 }
 0x145   : > { %v796_v58 = vpop.eup %795 }
 0x146   : > { %v798_v60 = vpop.eup %797  ;;  %v505_v62 = vmul.f32 %v796_v58, %v788_v54 }
 0x147   : > { %v800_v0 = vpop.eup %799  ;;  %v506_v1 = vmul.f32 %v798_v60, %v790_v55 }
 0x148   : > { %v802_v3 = vpop.eup %801  ;;  %v503_v4 = vmul.f32 %v800_v0, %v501_v59 }
 0x149   : > { %v504_v5 = vmul.f32 %v802_v3, %v502_v61 }
 0x14a   : > { %v507_v6 = vadd.f32 %v505_v62, %v503_v4 }
 0x14b   : > { %v508_v7 = vadd.f32 %v506_v1, %v504_v5 }
 0x14c   : > { %807 = vtanh.f32 %v507_v6  ;;  %515 = vst [vmem:[%s322_s29] sm:$0xff] %v507_v6 }
 0x14d   : > { %809 = vtanh.f32 %v508_v7  ;;  %516 = vst [vmem:[%s322_s29 + $0x8] sm:$0xff] %v508_v7 }
 0x14e   : > { %852 = shalt.err (!%p849_p12)
}
 0x14f   : > { %s853_s23 = scalar_lea.hbm %s1107_s12, 256  ;;  %s857_s29 = scalar_lea.hbm %s1188_s5, 512 }
 0x150   : > { %p854_p13 = scmp.ne.s32.totalorder %s1107_s12, %s853_s23  ;;  %p858_p2 = scmp.lt.u32.totalorder %s1107_s12, %s1188_s5 }
 0x151   : > { %p859_p11 = scmp.lt.u32.totalorder %s857_s29, %s853_s23  ;;  %p861_p6 = scmp.lt.u32.totalorder %s853_s23, %s1107_s12 }
 0x152   : > { %p855_p1 = pnand %p854_p13, %p1197_p9 }
 0x153   : > { %p860_p5 = por %p859_p11, %p858_p2 }
 0x154   : > { %p856_p0 = pneg %p855_p1 }
 0x155   : > { %p862_p10 = por %p861_p6, %p860_p5 }
 0x157   : > { %p863_p3 = pnand %p862_p10, %p856_p0 }
 0x159   : > { %866 = shalt.err (!%p863_p3)
}
 0x15a   : > { %723 = dma.vmem_to_hbm [thread:$0]  (%p1197_p9), %s1109_s8, 256, %s1107_s12, %s523_s13   ;;  %v804_v8 = vpop.eup %803 }
 0x15b   : > { %v806_v9 = vpop.eup %805  ;;  %s315_s15 = scalar_lea.vmem [#allocation6], %s1070_s10  ;;  %s1139_s23 = scalar_lea.hbm %s1187_s4, %s710_s25 }
 0x15c   : > { %s537_s14 = sshll.u32 %s315_s15, 4  ;;  %v808_v10 = vpop.eup %807  ;;  %s518_s8 = scalar_lea.sflag [#allocation5], %s1066_s26  ;;  %s1141_s14 = int_to_ptr.vmem [resolvable:$true] %s537_s14 }
 0x15d   : > { %v810_v11 = vpop.eup %809  ;;  %v511_v12 = vmul.f32 %v808_v10, %v804_v8  ;;  %s867_s10 = scalar_lea.vmem %s1141_s14, 256  ;;  %s942_s12 = smov [#allocation6]  }
 0x15e   : > { %v512_v13 = vmul.f32 %v810_v11, %v806_v9  ;;  %p868_p4 = scmp.ne.s32.totalorder %s1141_s14, %s867_s10  ;;  %s871_s22 = sshll.u32 %s942_s12, 4  ;;  %s872_s22 = int_to_ptr.vmem [resolvable:$false] %s871_s22 }
 0x15f   : > { %513 = vst [vmem:[%s315_s15] sm:$0xff] %v511_v12  ;;  %s873_s13 = scalar_lea.vmem %s872_s22, 512  ;;  %p874_p12 = scmp.lt.s32.totalorder %s1141_s14, %s872_s22 }
 0x160   : > { %514 = vst [vmem:[%s315_s15 + $0x8] sm:$0xff] %v512_v13  ;;  %p869_p7 = pnand %p868_p4, %p1197_p9  ;;  %p875_p13 = scmp.lt.s32.totalorder %s873_s13, %s867_s10 }
 0x162   : > { %p870_p8 = pneg %p869_p7  ;;  %p876_p1 = por %p875_p13, %p874_p12 }
 0x164   : > { %p877_p0 = pnand %p876_p1, %p870_p8 }
 0x166   : > { %880 = shalt.err (!%p877_p0)
}
 0x167   : > { %s881_s26 = scalar_lea.hbm %s1139_s23, 256  ;;  %s885_s28 = scalar_lea.hbm %s1187_s4, 512 }
 0x168   : > { %p882_p2 = scmp.ne.s32.totalorder %s1139_s23, %s881_s26  ;;  %p886_p6 = scmp.lt.u32.totalorder %s1139_s23, %s1187_s4 }
 0x169   : > { %p887_p10 = scmp.lt.u32.totalorder %s885_s28, %s881_s26  ;;  %p889_p4 = scmp.lt.u32.totalorder %s881_s26, %s1139_s23 }
 0x16a   : > { %p883_p11 = pnand %p882_p2, %p1197_p9 }
 0x16b   : > { %p888_p3 = por %p887_p10, %p886_p6 }
 0x16c   : > { %p884_p5 = pneg %p883_p11 }
 0x16d   : > { %p890_p7 = por %p889_p4, %p888_p3 }
 0x16f   : > { %p891_p8 = pnand %p890_p7, %p884_p5 }
 0x171   : > { %894 = shalt.err (!%p891_p8)
}
 0x172   : > { %722 = dma.vmem_to_hbm [thread:$0]  (%p1197_p9), %s1141_s14, 256, %s1139_s23, %s518_s8  }
 0x173 PF: > { %s563_s11 = sand.u32 1, %s925_s18   ;;  %p1198_p12 = scmp.ne.s32.totalorder %s1195_s6, 0 }
 0x174   : > { %p1199_p13 = scmp.ge.s32.totalorder %s937_s21, 2  ;;  %s564_s15 = scalar_lea.sflag [#allocation5], %s563_s11 }
 0x176   : > { %p727_p1 = pnand %p1199_p13, %p1198_p12 }
 0x178   : > { %916 = dma.done.wait (!%p727_p1), %s564_s15, 256  }
 0x179   : > { %918 = vsyncadd (!%p727_p1), %s564_s15, 4294967040  ;;  %s573_s16 = scalar_lea.sflag [#allocation8], %s563_s11 }
 0x17a   : > { %920 = dma.done.wait (!%p727_p1), %s573_s16, 256  }
 0x17b   : > { %922 = vsyncadd (!%p727_p1), %s573_s16, 4294967040  ;;  %p22_p9 = scmp.ge.s32.totalorder %s998_s24, 4   ;;  %s1200_s18 = smov %s929_s19 }
 0x17c   : > { %s1201_s19 = smov %s933_s20  ;;  %s1202_s20 = smov %s1010_s27 }
 0x17d   : > { %s1203_s21 = smov %s998_s24  ;;  %24 = sbr.rel (!%p22_p9) target bundleno = 7 (0x7), region = 144 }
 0x184   :  { %578 = vsyncpa [#allocation4], 1 }
 0x185   :  { %580 = vsyncpa [#allocation4 + $0x1], 1 }
 0x186   :  { %581 = vsyncpa [#allocation5], 1 }
 0x187   :  { %583 = vsyncpa [#allocation5 + $0x1], 1 }
 0x188   :  { %584 = vsyncpa [#allocation8], 1 }
 0x189   :  { %586 = vsyncpa [#allocation8 + $0x1], 1 }

</bundles_post_ra>
